<compile_context>
chip_gen: v7x
topology: tpu7x:2x2x1
jax: 0.10.0
libtpu: 0.0.40
codegen_flags: <defaults>
</compile_context>

<pallas_src>
import jax
import jax.numpy as jnp
from jax.experimental import pallas as pl
from jax.experimental.pallas import tpu as pltpu

_LANE = 128


def _round_up(x, m):
    return ((x + m - 1) // m) * m


def _pad2(x, rows, cols):
    r, c = x.shape
    if r == rows and c == cols:
        return x
    return jnp.pad(x, ((0, rows - r), (0, cols - c)))


def _vmem_budget_bytes():
    """Generation-aware scoped-VMEM budget (~80% of physical, capped at 100 MiB)."""
    try:
        cap = int(pltpu.get_tpu_info().vmem_capacity_bytes)
    except Exception:
        # No TPU info available -> assume the smallest generation (v7x, 64 MiB/TC).
        cap = 64 * 1024 * 1024
    return min(int(cap * 0.8), 100 * 1024 * 1024)


def _make_kernel(dim1, eps):
    inv_n = 1.0 / float(dim1)
    eps = float(eps)

    def _layer_norm(x_f32, gamma, beta, lane_mask):
        # Two-pass LayerNorm in f32 (numerically safer than E[x^2] - mean^2).
        # Padded lanes of x are exactly zero, so sum(x) over the padded width
        # is exact; the variance sum masks the padded lanes (whose centered
        # value would be -mean).  Padded gamma/beta are zero, so padded output
        # lanes stay exactly zero.
        mean = jnp.sum(x_f32, axis=-1, keepdims=True) * inv_n
        centered = x_f32 - mean
        var = jnp.sum(jnp.square(centered * lane_mask), axis=-1, keepdims=True) * inv_n
        return centered * jax.lax.rsqrt(var + eps) * gamma + beta

    def kernel(a_ref, b_ref, w_eff_ref, hw_ref, vec_ref, out_ref):
        vecs = vec_ref[...]                       # (8, dim1_p) f32, packed rows
        b_eff = vecs[0:1, :]
        g_emb, beta_emb = vecs[1:2, :], vecs[2:3, :]
        g_hid, beta_hid = vecs[3:4, :], vecs[4:5, :]
        lane_mask = vecs[5:6, :]

        cdt = w_eff_ref.dtype                     # MXU operand dtype (bf16 default)

        # --- instance-guided mask: single fused matmul, f32 accumulation ----
        v_mask = jnp.dot(b_ref[...].astype(cdt), w_eff_ref[...],
                         preferred_element_type=jnp.float32) + b_eff

        # --- LayerNorm on the embedding input (apply_ln_emb=True) -----------
        a_ln = _layer_norm(a_ref[...].astype(jnp.float32), g_emb, beta_emb, lane_mask)

        # --- feature-wise multiplication, hidden projection, LN, ReLU -------
        v_masked = v_mask * a_ln
        v_hidden = jnp.dot(v_masked.astype(cdt), hw_ref[...],
                           preferred_element_type=jnp.float32)
        v_hidden = _layer_norm(v_hidden, g_hid, beta_hid, lane_mask)
        out_ref[...] = jnp.maximum(v_hidden, 0.0).astype(out_ref.dtype)

    return kernel


def mask_block_layer(input_a, input_b, params, *, compute_dtype=jnp.bfloat16,
                     block_b=None, eps=1e-5):
    """Pallas implementation of MaskBlockLayer.forward.

    compute_dtype controls the MXU operand dtype (weights + cast activations);
    accumulation and LayerNorm statistics are always f32.
    """
    if input_a.ndim == 3:
        # (batch, seq, dim1): V_mask (batch, dim1) broadcasts over seq.
        # TODO(synk): this flattening recomputes the (cheap) mask matmul per
        #             seq position instead of broadcasting it.
        b_, s_, d_ = input_a.shape
        out = mask_block_layer(input_a.reshape(b_ * s_, d_),
                               jnp.repeat(input_b, s_, axis=0), params,
                               compute_dtype=compute_dtype, block_b=block_b, eps=eps)
        return out.reshape(b_, s_, d_)

    batch, dim1 = input_a.shape
    _, dim2 = input_b.shape
    f32 = jnp.float32
    hp = jax.lax.Precision.HIGHEST
    out_dtype = input_a.dtype

    # --- lane-dense feature padding (multiple of 128) ------------------------
    dim1_p = _round_up(dim1, _LANE)
    dim2_p = _round_up(dim2, _LANE)

    # --- fuse the two bias-only mask linears (exact up to rounding) ----------
    #   x @ W1^T @ W2^T = x @ (W2 @ W1)^T ;   b_eff = b1 @ W2^T + b2
    w1 = params["w1"].astype(f32)                       # (hidden, dim2)
    w2 = params["w2"].astype(f32)                       # (dim1, hidden)
    w_eff = jnp.dot(w2, w1, precision=hp).T             # (dim2, dim1)
    b_eff = (jnp.dot(params["b1"].astype(f32), w2.T, precision=hp)
             + params["b2"].astype(f32))                # (dim1,)

    w_eff_p = _pad2(w_eff, dim2_p, dim1_p).astype(compute_dtype)
    hw_p = _pad2(params["hidden_weight"].astype(f32),
                 dim1_p, dim1_p).astype(compute_dtype)

    # --- pack the six 1-row vectors into one (8, dim1_p) f32 constant --------
    def _row(v):
        return jnp.pad(v.astype(f32), (0, dim1_p - dim1))

    lane_mask = (jnp.arange(dim1_p) < dim1).astype(f32)
    zeros_row = jnp.zeros((dim1_p,), f32)
    vecs = jnp.stack([_row(b_eff),
                      _row(params["ln_emb_w"]), _row(params["ln_emb_b"]),
                      _row(params["ln_hid_w"]), _row(params["ln_hid_b"]),
                      lane_mask, zeros_row, zeros_row], axis=0)

    # --- batch tiling: VMEM-budget-aware block size, >= 2 grid steps ---------
    sub = 16 if (input_a.dtype == jnp.bfloat16 or input_b.dtype == jnp.bfloat16) else 8
    budget = _vmem_budget_bytes()
    wsize = jnp.dtype(compute_dtype).itemsize
    weight_bytes = (dim2_p * dim1_p + dim1_p * dim1_p) * wsize + 8 * dim1_p * 4
    act_row_bytes = (dim1_p * input_a.dtype.itemsize
                     + dim2_p * input_b.dtype.itemsize
                     + dim1_p * jnp.dtype(out_dtype).itemsize)
    if block_b is None:
        # Weights/packed vectors are double-buffered residents; spend the rest
        # of the budget (minus 2 MiB compiler-scratch headroom) on the
        # double-buffered activation tiles, capped at 2048 rows.
        avail = budget - 2 * weight_bytes - 2 * 1024 * 1024
        cap_rows = max(sub, (avail // (2 * act_row_bytes)) // sub * sub)
        # Keep at least 2 grid steps so v7x's two TensorCores both get work
        # (and the pipeline has DMA/compute to overlap).
        split_rows = _round_up(pl.cdiv(max(batch, 1), 2), sub)
        block_b = int(max(sub, min(2048, cap_rows, split_rows)))
    block_b = _round_up(int(block_b), sub)

    batch_p = _round_up(batch, block_b)
    grid = (batch_p // block_b,)

    a_p = _pad2(input_a, batch_p, dim1_p)
    b_p = _pad2(input_b, batch_p, dim2_p)

    def batch_spec(cols):
        return pl.BlockSpec((block_b, cols), lambda i: (i, 0))

    def const_spec(rows, cols):
        return pl.BlockSpec((rows, cols), lambda i: (0, 0))

    kernel = _make_kernel(dim1, eps)

    out = pl.pallas_call(
        kernel,
        out_shape=jax.ShapeDtypeStruct((batch_p, dim1_p), out_dtype),
        grid_spec=pltpu.PrefetchScalarGridSpec(
            num_scalar_prefetch=0,
            grid=grid,
            in_specs=[
                batch_spec(dim1_p),             # input_a tile
                batch_spec(dim2_p),             # input_b tile
                const_spec(dim2_p, dim1_p),     # fused mask weight
                const_spec(dim1_p, dim1_p),     # hidden_weight
                const_spec(8, dim1_p),          # packed bias / LN / lane-mask rows
            ],
            out_specs=batch_spec(dim1_p),
        ),
        compiler_params=pltpu.CompilerParams(
            dimension_semantics=("parallel",),
            vmem_limit_bytes=int(budget),
        ),
    )(a_p, b_p, w_eff_p, hw_p, vecs)

    return out[:batch, :dim1]


def make_params(key, dim1, dim2, hidden):
    """Deterministic synthetic init matching the module's parameter shapes."""
    k1, k2, k3, k4, k5 = jax.random.split(key, 5)

    def xavier_normal(k, shape):
        fan_out, fan_in = shape
        std = (2.0 / (fan_in + fan_out)) ** 0.5
        return std * jax.random.normal(k, shape, dtype=jnp.float32)

    return {
        "w1": xavier_normal(k1, (hidden, dim2)),
        "b1": 0.01 * jax.random.normal(k2, (hidden,), dtype=jnp.float32),
        "w2": xavier_normal(k3, (dim1, hidden)),
        "b2": 0.01 * jax.random.normal(k4, (dim1,), dtype=jnp.float32),
        "ln_emb_w": jnp.ones((dim1,), jnp.float32),
        "ln_emb_b": jnp.zeros((dim1,), jnp.float32),
        "hidden_weight": xavier_normal(k5, (dim1, dim1)),
        "ln_hid_w": jnp.ones((dim1,), jnp.float32),
        "ln_hid_b": jnp.zeros((dim1,), jnp.float32),
    }


def mask_block_reference(input_a, input_b, params, eps=1e-5):
    """Pure-JAX reference matching the PyTorch forward (HIGHEST precision)."""
    hp = jax.lax.Precision.HIGHEST
    v1 = jnp.dot(input_b, params["w1"].T, precision=hp) + params["b1"]
    v_mask = jnp.dot(v1, params["w2"].T, precision=hp) + params["b2"]

    def ln(x, g, b):
        m = jnp.mean(x, axis=-1, keepdims=True)
        v = jnp.mean((x - m) ** 2, axis=-1, keepdims=True)
        return (x - m) / jnp.sqrt(v + eps) * g + b

    a_ln = ln(input_a, params["ln_emb_w"], params["ln_emb_b"])
    v_masked = v_mask * a_ln
    v_hidden = ln(jnp.dot(v_masked, params["hidden_weight"], precision=hp),
                  params["ln_hid_w"], params["ln_hid_b"])
    return jnp.maximum(v_hidden, 0.0)


if __name__ == "__main__":
    key = jax.random.PRNGKey(0)
    batch, dim1, dim2, hidden = 16, 32, 16, 32

    k_a, k_b, k_p = jax.random.split(key, 3)
    input_a = jax.random.normal(k_a, (batch, dim1), dtype=jnp.float32)
    input_b = jax.random.normal(k_b, (batch, dim2), dtype=jnp.float32)
    params = make_params(k_p, dim1, dim2, hidden)

    ref = mask_block_reference(input_a, input_b, params)

    # f32-operand path: tight numerical check against the pure-JAX reference.
    out_f32 = jax.block_until_ready(
        mask_block_layer(input_a, input_b, params, compute_dtype=jnp.float32))
    assert out_f32.shape == (batch, dim1)
    err_f32 = jnp.max(jnp.abs(out_f32 - ref))
    assert jnp.allclose(out_f32, ref, atol=1e-3, rtol=1e-3), f"f32 max err = {err_f32}"

    # Default bf16-operand path (full-rate MXU, halved weight HBM/VMEM bytes);
    # f32 accumulation + f32 LN stats keep the error at bf16-rounding level.
    out_bf16 = jax.block_until_ready(mask_block_layer(input_a, input_b, params))
    assert out_bf16.shape == (batch, dim1)
    err_bf16 = jnp.max(jnp.abs(out_bf16 - ref))
    assert jnp.allclose(out_bf16, ref, atol=8e-2, rtol=8e-2), f"bf16 max err = {err_bf16}"

    print("KERNEL_OK")
</pallas_src>

<mosaic_0001>
module attributes {stable_mosaic.version = 11 : i64} {
  func.func @kernel(%arg0: i32, %arg1: memref<8x128xf32, #tpu.memory_space<vmem>>, %arg2: memref<8x128xf32, #tpu.memory_space<vmem>>, %arg3: memref<128x128xf32, #tpu.memory_space<vmem>>, %arg4: memref<128x128xf32, #tpu.memory_space<vmem>>, %arg5: memref<8x128xf32, #tpu.memory_space<vmem>>, %arg6: memref<8x128xf32, #tpu.memory_space<vmem>>) attributes {dimension_semantics = [#tpu.dimension_semantics<parallel>], iteration_bounds = array<i64: 2>, scalar_prefetch = 0 : i64, scratch_operands = 0 : i64, tpu.core_type = #tpu.core_type<tc>, window_params = [{transform_indices = @transform_0, window_bounds = array<i64: 8, 128>}, {transform_indices = @transform_1, window_bounds = array<i64: 8, 128>}, {pipeline_mode = #tpu.pipeline_mode<synchronous>, transform_indices = @transform_2, window_bounds = array<i64: 128, 128>}, {pipeline_mode = #tpu.pipeline_mode<synchronous>, transform_indices = @transform_3, window_bounds = array<i64: 128, 128>}, {pipeline_mode = #tpu.pipeline_mode<synchronous>, transform_indices = @transform_4, window_bounds = array<i64: 8, 128>}, {transform_indices = @transform_5, window_bounds = array<i64: 8, 128>}]} {
    %c0 = arith.constant 0 : index
    %c0_0 = arith.constant 0 : index
    %0 = vector.load %arg5[%c0, %c0_0] : memref<8x128xf32, #tpu.memory_space<vmem>>, vector<8x128xf32>
    %1 = vector.extract_strided_slice %0 {offsets = [0, 0], sizes = [1, 128], strides = [1, 1]} : vector<8x128xf32> to vector<1x128xf32>
    %2 = vector.extract_strided_slice %0 {offsets = [1, 0], sizes = [1, 128], strides = [1, 1]} : vector<8x128xf32> to vector<1x128xf32>
    %3 = vector.extract_strided_slice %0 {offsets = [2, 0], sizes = [1, 128], strides = [1, 1]} : vector<8x128xf32> to vector<1x128xf32>
    %4 = vector.extract_strided_slice %0 {offsets = [3, 0], sizes = [1, 128], strides = [1, 1]} : vector<8x128xf32> to vector<1x128xf32>
    %5 = vector.extract_strided_slice %0 {offsets = [4, 0], sizes = [1, 128], strides = [1, 1]} : vector<8x128xf32> to vector<1x128xf32>
    %6 = vector.extract_strided_slice %0 {offsets = [5, 0], sizes = [1, 128], strides = [1, 1]} : vector<8x128xf32> to vector<1x128xf32>
    %c0_1 = arith.constant 0 : index
    %c0_2 = arith.constant 0 : index
    %7 = vector.load %arg2[%c0_1, %c0_2] : memref<8x128xf32, #tpu.memory_space<vmem>>, vector<8x128xf32>
    %c0_3 = arith.constant 0 : index
    %c0_4 = arith.constant 0 : index
    %8 = vector.load %arg3[%c0_3, %c0_4] : memref<128x128xf32, #tpu.memory_space<vmem>>, vector<128x128xf32>
    %cst = arith.constant dense<0.000000e+00> : vector<8x128xf32>
    %9 = tpu.matmul %7, %8, %cst {dimension_numbers = #tpu.dot_dimension_numbers<[1], [0], [0], [1], [0, 0, 1, 1], [], []>} : vector<8x128xf32>, vector<128x128xf32>, vector<8x128xf32> -> vector<8x128xf32>
    %10 = vector.broadcast %1 : vector<1x128xf32> to vector<8x128xf32>
    %11 = arith.addf %9, %10 : vector<8x128xf32>
    %c0_5 = arith.constant 0 : index
    %c0_6 = arith.constant 0 : index
    %12 = vector.load %arg1[%c0_5, %c0_6] : memref<8x128xf32, #tpu.memory_space<vmem>>, vector<8x128xf32>
    %cst_7 = arith.constant dense<0.000000e+00> : vector<8xf32>
    %13 = vector.multi_reduction <add>, %12, %cst_7 [1] : vector<8x128xf32> to vector<8xf32>
    %14 = vector.shape_cast %13 : vector<8xf32> to vector<8x1xf32>
    %cst_8 = arith.constant 3.125000e-02 : f32
    %15 = vector.broadcast %cst_8 : f32 to vector<8x1xf32>
    %16 = arith.mulf %14, %15 : vector<8x1xf32>
    %17 = vector.broadcast %16 : vector<8x1xf32> to vector<8x128xf32>
    %18 = arith.subf %12, %17 : vector<8x128xf32>
    %19 = vector.broadcast %6 : vector<1x128xf32> to vector<8x128xf32>
    %20 = arith.mulf %18, %19 : vector<8x128xf32>
    %21 = arith.mulf %20, %20 : vector<8x128xf32>
    %cst_9 = arith.constant dense<0.000000e+00> : vector<8xf32>
    %22 = vector.multi_reduction <add>, %21, %cst_9 [1] : vector<8x128xf32> to vector<8xf32>
    %23 = vector.shape_cast %22 : vector<8xf32> to vector<8x1xf32>
    %cst_10 = arith.constant 3.125000e-02 : f32
    %24 = vector.broadcast %cst_10 : f32 to vector<8x1xf32>
    %25 = arith.mulf %23, %24 : vector<8x1xf32>
    %cst_11 = arith.constant 9.99999974E-6 : f32
    %26 = vector.broadcast %cst_11 : f32 to vector<8x1xf32>
    %27 = arith.addf %25, %26 : vector<8x1xf32>
    %28 = math.rsqrt %27 : vector<8x1xf32>
    %29 = vector.broadcast %28 : vector<8x1xf32> to vector<8x128xf32>
    %30 = arith.mulf %18, %29 : vector<8x128xf32>
    %31 = vector.broadcast %2 : vector<1x128xf32> to vector<8x128xf32>
    %32 = arith.mulf %30, %31 : vector<8x128xf32>
    %33 = vector.broadcast %3 : vector<1x128xf32> to vector<8x128xf32>
    %34 = arith.addf %32, %33 : vector<8x128xf32>
    %35 = arith.mulf %11, %34 : vector<8x128xf32>
    %c0_12 = arith.constant 0 : index
    %c0_13 = arith.constant 0 : index
    %36 = vector.load %arg4[%c0_12, %c0_13] : memref<128x128xf32, #tpu.memory_space<vmem>>, vector<128x128xf32>
    %cst_14 = arith.constant dense<0.000000e+00> : vector<8x128xf32>
    %37 = tpu.matmul %35, %36, %cst_14 {dimension_numbers = #tpu.dot_dimension_numbers<[1], [0], [0], [1], [0, 0, 1, 1], [], []>} : vector<8x128xf32>, vector<128x128xf32>, vector<8x128xf32> -> vector<8x128xf32>
    %cst_15 = arith.constant dense<0.000000e+00> : vector<8xf32>
    %38 = vector.multi_reduction <add>, %37, %cst_15 [1] : vector<8x128xf32> to vector<8xf32>
    %39 = vector.shape_cast %38 : vector<8xf32> to vector<8x1xf32>
    %cst_16 = arith.constant 3.125000e-02 : f32
    %40 = vector.broadcast %cst_16 : f32 to vector<8x1xf32>
    %41 = arith.mulf %39, %40 : vector<8x1xf32>
    %42 = vector.broadcast %41 : vector<8x1xf32> to vector<8x128xf32>
    %43 = arith.subf %37, %42 : vector<8x128xf32>
    %44 = vector.broadcast %6 : vector<1x128xf32> to vector<8x128xf32>
    %45 = arith.mulf %43, %44 : vector<8x128xf32>
    %46 = arith.mulf %45, %45 : vector<8x128xf32>
    %cst_17 = arith.constant dense<0.000000e+00> : vector<8xf32>
    %47 = vector.multi_reduction <add>, %46, %cst_17 [1] : vector<8x128xf32> to vector<8xf32>
    %48 = vector.shape_cast %47 : vector<8xf32> to vector<8x1xf32>
    %cst_18 = arith.constant 3.125000e-02 : f32
    %49 = vector.broadcast %cst_18 : f32 to vector<8x1xf32>
    %50 = arith.mulf %48, %49 : vector<8x1xf32>
    %cst_19 = arith.constant 9.99999974E-6 : f32
    %51 = vector.broadcast %cst_19 : f32 to vector<8x1xf32>
    %52 = arith.addf %50, %51 : vector<8x1xf32>
    %53 = math.rsqrt %52 : vector<8x1xf32>
    %54 = vector.broadcast %53 : vector<8x1xf32> to vector<8x128xf32>
    %55 = arith.mulf %43, %54 : vector<8x128xf32>
    %56 = vector.broadcast %4 : vector<1x128xf32> to vector<8x128xf32>
    %57 = arith.mulf %55, %56 : vector<8x128xf32>
    %58 = vector.broadcast %5 : vector<1x128xf32> to vector<8x128xf32>
    %59 = arith.addf %57, %58 : vector<8x128xf32>
    %cst_20 = arith.constant 0.000000e+00 : f32
    %60 = vector.broadcast %cst_20 : f32 to vector<8x128xf32>
    %61 = arith.maximumf %59, %60 : vector<8x128xf32>
    %c0_21 = arith.constant 0 : index
    %c0_22 = arith.constant 0 : index
    %62 = vector.load %arg6[%c0_21, %c0_22] : memref<8x128xf32, #tpu.memory_space<vmem>>, vector<8x128xf32>
    tpu.vector_store %arg6[%c0_21, %c0_22], %61 {strides = array<i32>} : memref<8x128xf32, #tpu.memory_space<vmem>>, vector<8x128xf32>,
    return
  }
  func.func @transform_0(%arg0: i32) -> (i32, i32) {
    %c0_i32 = arith.constant 0 : i32
    %c0_i32_0 = arith.constant 0 : i32
    return %arg0, %c0_i32 : i32, i32
  }
  func.func @transform_1(%arg0: i32) -> (i32, i32) {
    %c0_i32 = arith.constant 0 : i32
    %c0_i32_0 = arith.constant 0 : i32
    return %arg0, %c0_i32 : i32, i32
  }
  func.func @transform_2(%arg0: i32) -> (i32, i32) {
    %c0_i32 = arith.constant 0 : i32
    %c0_i32_0 = arith.constant 0 : i32
    %c0_i32_1 = arith.constant 0 : i32
    return %c0_i32, %c0_i32_0 : i32, i32
  }
  func.func @transform_3(%arg0: i32) -> (i32, i32) {
    %c0_i32 = arith.constant 0 : i32
    %c0_i32_0 = arith.constant 0 : i32
    %c0_i32_1 = arith.constant 0 : i32
    return %c0_i32, %c0_i32_0 : i32, i32
  }
  func.func @transform_4(%arg0: i32) -> (i32, i32) {
    %c0_i32 = arith.constant 0 : i32
    %c0_i32_0 = arith.constant 0 : i32
    %c0_i32_1 = arith.constant 0 : i32
    return %c0_i32, %c0_i32_0 : i32, i32
  }
  func.func @transform_5(%arg0: i32) -> (i32, i32) {
    %c0_i32 = arith.constant 0 : i32
    %c0_i32_0 = arith.constant 0 : i32
    return %arg0, %c0_i32 : i32, i32
  }
}

</mosaic_0001>

<bundles_post_ra>
// kernel: tpu_custom_call.1
= control target key start
LH: loop header
LB: loop body
LE: loop exit
PB: predicated region body
PF: predicated region fallthrough
CT: control target
= control target key end

     0   :  { %s1461_s0 = inlined_call_operand.hbm [shape: f32[16,128], index: 0, kind: input, shape index: {}]   ;;  %s1462_s1 = inlined_call_operand.hbm [shape: f32[16,128], index: 1, kind: input, shape index: {}]   ;;  %s1463_s2 = inlined_call_operand.hbm [shape: f32[128,128], index: 2, kind: input, shape index: {}]   ;;  %s1464_s3 = inlined_call_operand.hbm [shape: f32[128,128], index: 3, kind: input, shape index: {}]   ;;  %s1465_s4 = inlined_call_operand.vmem [shape: f32[8,128], index: 4, kind: input, shape index: {}]   ;;  %s1466_s5 = inlined_call_operand.hbm [shape: f32[16,128], index: 5, kind: output, shape index: {}]  }
   0x1   :  { %1471 = sst [smem:[#allocation16_spill]] %s1463_s2 }
   0x2   :  { %1472 = sst [smem:[#allocation17_spill]] %s1464_s3 }
   0x3   :  { %10 = vsyncpa [#allocation3], 0 }
   0x4   :  { %12 = vsyncpa [#allocation3 + $0x1], 0 }
   0x5   :  { %13 = vsyncpa [#allocation6], 0 }
   0x6   :  { %15 = vsyncpa [#allocation6 + $0x1], 0 }
   0x7   :  { %16 = vsyncpa [#allocation9], 0 }
   0x8   :  { %17 = vsyncpa [#allocation4], 0 }
   0x9   :  { %19 = vsyncpa [#allocation4 + $0x1], 0  ;;  %s1150_s18 = smov 0   ;;  %s1152_s19 = smov 0  }
   0xa   :  { %s1154_s20 = smov 0   ;;  %s1156_s21 = smov 0  }
   0xb LB: > { %s1171_s22 = sadd.s32 4294967295, %s1108_s21   ;;  %s662_s23 = sadd.s32 4294967294, %s1108_s21   ;;  %s1108_s21 = sphi %s1156_s21, %s1494_s21   ;;  %s1104_s20 = sphi %s1154_s20, %s1493_s20   ;;  %s1100_s19 = sphi %s1152_s19, %s1492_s19   ;;  %s1096_s18 = sphi %s1150_s18, %s1491_s18  }
   0xc   : > { %p45_p0 = scmp.ne.s32.totalorder %s1100_s19, %s1096_s18  ;;  %p1467_p1 = scmp.eq.s32.totalorder %s1171_s22, 0 }
   0xd   : > { %p164_p3 = scmp.eq.s32.totalorder %s662_s23, 1  ;;  %p663_p5 = scmp.ge.s32.totalorder %s1108_s21, 1 }
   0xe   : > { %p1180_p4 = por %p1467_p1, %p45_p0  ;;  %p171_p7 = scmp.lt.s32.totalorder %s1108_s21, 3 }
   0xf   : > { %p1185_p6 = por %p164_p3, %p45_p0  ;;  %s1110_s27 = smov [#allocation7]  }
  0x10   : > { %s1473_s24 = scalar_select %p1180_p4, 1, 0 }
  0x11   : > { %s1474_s25 = scalar_select %p1185_p6, 1, 0 }
  0x12   : > { %p1190_p8 = pnand %p663_p5, %p171_p7  ;;  %s183_s28 = sshll.u32 %s1110_s27, 4  ;;  %s1194_s28 = int_to_ptr.vmem [resolvable:$true] %s183_s28 }
  0x13   : > { %s1111_s30 = smov [#allocation8]   ;;  %s1477_s2 = sld [smem:[#allocation16_spill]] }
  0x14   : > { %s1475_s26 = scalar_select %p1190_p8, 1, 0 }
  0x15   : > { %p847_p9 = pneg %p1190_p8  ;;  %s196_s6 = sshll.u32 %s1111_s30, 4  ;;  %s1205_s6 = int_to_ptr.vmem [resolvable:$true] %s196_s6 }
  0x17   : > { %p1201_p11 = pnand %p847_p9, %p1467_p1 }
  0x19   : > { %s914_s9 = scalar_lea.hbm %s1477_s2, 2048  ;;  %p916_p13 = pneg %p1201_p11 }
  0x1a   : > { %p915_p12 = scmp.ne.s32.totalorder %s1477_s2, %s914_s9  ;;  %p921_p5 = scmp.lt.u32.totalorder %s914_s9, %s1477_s2 }
  0x1c   : > { %p917_p0 = pnand %p916_p13, %p915_p12 }
  0x1e   : > { %p918_p3 = pneg %p917_p0 }
  0x20   : > { %p923_p7 = pnand %p921_p5, %p918_p3 }
  0x22   : > { %926 = shalt.err (!%p923_p7)
}
  0x23   : > { %s927_s14 = scalar_lea.vmem %s1194_s28, 2048  ;;  %p935_p2 = scmp.lt.s32.totalorder %s1194_s28, %s1194_s28 }
  0x24   : > { %p928_p9 = scmp.ne.s32.totalorder %s1194_s28, %s927_s14  ;;  %p936_p12 = scmp.lt.s32.totalorder %s927_s14, %s927_s14 }
  0x26   : > { %p930_p10 = pnand %p928_p9, %p916_p13  ;;  %p937_p0 = por %p936_p12, %p935_p2 }
  0x28   : > { %p931_p1 = pneg %p930_p10 }
  0x2a   : > { %p938_p6 = pnand %p937_p0, %p931_p1 }
  0x2c   : > { %941 = shalt.err (!%p938_p6)
}
  0x2d   : > { %s1112_s15 = smov 128   ;;  %s1113_s16 = smov 8  }
  0x2e   : > { %850 = dma.hbm_to_vmem [thread:$0]  (!%p1201_p11), %s1477_s2, 2048, %s1194_s28, [#allocation6], %s1112_s15, %s1112_s15, %s1113_s16  }
  0x2f   : > { %s1478_s3 = sld [smem:[#allocation17_spill]] }
  0x35   : > { %s942_s7 = scalar_lea.hbm %s1478_s3, 2048 }
  0x36   : > { %p943_p2 = scmp.ne.s32.totalorder %s1478_s3, %s942_s7  ;;  %p949_p10 = scmp.lt.u32.totalorder %s942_s7, %s1478_s3 }
  0x38   : > { %p945_p1 = pnand %p943_p2, %p916_p13 }
  0x3a   : > { %p946_p6 = pneg %p945_p1 }
  0x3c   : > { %p951_p3 = pnand %p949_p10, %p946_p6 }
  0x3e   : > { %954 = shalt.err (!%p951_p3)
}
  0x3f   : > { %s955_s28 = scalar_lea.vmem %s1205_s6, 2048  ;;  %p963_p12 = scmp.lt.s32.totalorder %s1205_s6, %s1205_s6 }
  0x40   : > { %p956_p5 = scmp.ne.s32.totalorder %s1205_s6, %s955_s28  ;;  %p964_p0 = scmp.lt.s32.totalorder %s955_s28, %s955_s28 }
  0x42   : > { %p958_p7 = pnand %p956_p5, %p916_p13  ;;  %p965_p2 = por %p964_p0, %p963_p12 }
  0x44   : > { %p959_p9 = pneg %p958_p7 }
  0x46   : > { %p966_p1 = pnand %p965_p2, %p959_p9 }
  0x48   : > { %969 = shalt.err (!%p966_p1)
}
  0x49   : > { %853 = dma.hbm_to_vmem [thread:$0]  (!%p1201_p11), %s1478_s3, 2048, %s1205_s6, [#allocation9], %s1112_s15, %s1112_s15, %s1113_s16  }
  0x4a   : > { %s1260_s14 = sadd.s32 1, %s1108_s21   ;;  %s32_s29 = sadd.s32 1, %s1104_s20 }
  0x4b   : > { %s29_s17 = ssub.s32 %s1108_s21, %s1260_s14  ;;  %p39_p13 = scmp.ne.s32.totalorder %s1104_s20, %s1100_s19 }
  0x4c   : > { %p30_p6 = scmp.eq.s32.totalorder %s29_s17, 0  ;;  %p40_p10 = scmp.eq.s32.totalorder %s1108_s21, 0 }
  0x4d   : > { %p1479_p3 = scmp.eq.s32.totalorder %s1171_s22, 1  ;;  %p867_p7 = scmp.lt.s32.totalorder %s1108_s21, 2 }
  0x4e   : > { %s1276_s27 = scalar_select %p30_p6, %s1104_s20, %s32_s29  }
  0x4f   : > { %p1270_p5 = por %p1479_p3, %p39_p13  ;;  %p41_p9 = por %p40_p10, %p39_p13 }
  0x50   : > { %s213_s30 = sand.u32 1, %s1104_s20   ;;  %s668_s15 = sshll.u32 %s1108_s21, 7 }
  0x51   : > { %s1480_s23 = scalar_select %p1270_p5, 1, 0 }
  0x52   : > { %s1279_s6 = sshll.u32 %s213_s30, 3  ;;  %s1285_s8 = scalar_lea.hbm %s1461_s0, %s668_s15 }
  0x53   : > { %s217_s9 = scalar_lea.vmem [#allocation2], %s1279_s6  ;;  %p1290_p11 = pnand %p867_p7, %p41_p9 }
  0x54   : > { %s224_s10 = sshll.u32 %s217_s9, 4  ;;  %s1297_s13 = scalar_lea.hbm %s1462_s1, %s668_s15  ;;  %s1288_s10 = int_to_ptr.vmem [resolvable:$true] %s224_s10 }
  0x55   : > { %s231_s29 = sand.u32 1, %s1108_s21   ;;  %s214_s17 = scalar_lea.sflag [#allocation3], %s213_s30 }
  0x56   : > { %s970_s16 = scalar_lea.hbm %s1285_s8, 128  ;;  %p972_p0 = pneg %p1290_p11 }
  0x57   : > { %p971_p12 = scmp.ne.s32.totalorder %s1285_s8, %s970_s16  ;;  %s975_s2 = scalar_lea.hbm %s1461_s0, 256 }
  0x58   : > { %p976_p13 = scmp.lt.u32.totalorder %s1285_s8, %s1461_s0  ;;  %p977_p6 = scmp.lt.u32.totalorder %s975_s2, %s970_s16 }
  0x59   : > { %p973_p2 = pnand %p972_p0, %p971_p12  ;;  %p979_p3 = scmp.lt.u32.totalorder %s970_s16, %s1285_s8 }
  0x5a   : > { %p978_p10 = por %p977_p6, %p976_p13 }
  0x5b   : > { %p974_p1 = pneg %p973_p2 }
  0x5c   : > { %p980_p7 = por %p979_p3, %p978_p10 }
  0x5e   : > { %p981_p9 = pnand %p980_p7, %p974_p1 }
  0x60   : > { %984 = shalt.err (!%p981_p9)
}
  0x61   : > { %s985_s30 = scalar_lea.vmem %s1288_s10, 128  ;;  %s1114_s15 = smov [#allocation2]  }
  0x62   : > { %p986_p12 = scmp.ne.s32.totalorder %s1288_s10, %s985_s30  ;;  %s990_s12 = sshll.u32 %s1114_s15, 4  ;;  %s991_s12 = int_to_ptr.vmem [resolvable:$false] %s990_s12 }
  0x63   : > { %s992_s3 = scalar_lea.vmem %s991_s12, 256  ;;  %p993_p4 = scmp.lt.s32.totalorder %s1288_s10, %s991_s12 }
  0x64   : > { %p988_p2 = pnand %p986_p12, %p972_p0  ;;  %p994_p13 = scmp.lt.s32.totalorder %s992_s3, %s985_s30 }
  0x66   : > { %p989_p5 = pneg %p988_p2  ;;  %p995_p6 = por %p994_p13, %p993_p4 }
  0x68   : > { %p996_p10 = pnand %p995_p6, %p989_p5 }
  0x6a   : > { %999 = shalt.err (!%p996_p10)
}
  0x6b   : > { %857 = dma.hbm_to_vmem [thread:$0]  (!%p1290_p11), %s1285_s8, 128, %s1288_s10, %s214_s17  }
  0x6c   : > { %s235_s2 = scalar_lea.vmem [#allocation5], %s1279_s6  ;;  %s232_s7 = scalar_lea.sflag [#allocation6], %s231_s29 }
  0x6d   : > { %s242_s16 = sshll.u32 %s235_s2, 4  ;;  %s1000_s9 = scalar_lea.hbm %s1297_s13, 128  ;;  %s243_s16 = int_to_ptr.vmem [resolvable:$true] %s242_s16 }
  0x6e   : > { %p1001_p4 = scmp.ne.s32.totalorder %s1297_s13, %s1000_s9  ;;  %s1005_s15 = scalar_lea.hbm %s1462_s1, 256 }
  0x6f   : > { %p1006_p3 = scmp.lt.u32.totalorder %s1297_s13, %s1462_s1  ;;  %p1007_p7 = scmp.lt.u32.totalorder %s1005_s15, %s1000_s9 }
  0x70   : > { %p1003_p5 = pnand %p1001_p4, %p972_p0  ;;  %p1009_p12 = scmp.lt.u32.totalorder %s1000_s9, %s1297_s13 }
  0x71   : > { %p1008_p9 = por %p1007_p7, %p1006_p3 }
  0x72   : > { %p1004_p1 = pneg %p1003_p5 }
  0x73   : > { %p1010_p2 = por %p1009_p12, %p1008_p9 }
  0x75   : > { %p1011_p13 = pnand %p1010_p2, %p1004_p1 }
  0x77   : > { %1014 = shalt.err (!%p1011_p13)
}
  0x78   : > { %s1015_s6 = scalar_lea.vmem %s243_s16, 128  ;;  %s1115_s8 = smov [#allocation5]  }
  0x79   : > { %p1016_p6 = scmp.ne.s32.totalorder %s243_s16, %s1015_s6  ;;  %s1020_s10 = sshll.u32 %s1115_s8, 4  ;;  %s1021_s10 = int_to_ptr.vmem [resolvable:$false] %s1020_s10 }
  0x7a   : > { %s1022_s29 = scalar_lea.vmem %s1021_s10, 256  ;;  %p1023_p5 = scmp.lt.s32.totalorder %s243_s16, %s1021_s10 }
  0x7b   : > { %p1018_p10 = pnand %p1016_p6, %p972_p0  ;;  %p1024_p8 = scmp.lt.s32.totalorder %s1022_s29, %s1015_s6 }
  0x7d   : > { %p1019_p4 = pneg %p1018_p10  ;;  %p1025_p3 = por %p1024_p8, %p1023_p5 }
  0x7f   : > { %p1026_p7 = pnand %p1025_p3, %p1019_p4 }
  0x81   : > { %1029 = shalt.err (!%p1026_p7)
}
  0x82   : > { %860 = dma.hbm_to_vmem [thread:$0]  (!%p1290_p11), %s1297_s13, 128, %s243_s16, %s232_s7  }
  0x83   : > { %p1482_p1 = scmp.ne.s32.totalorder %s1475_s26, 0 }
  0x84   : > { %s1350_s17 = sand.u32 (!%p1482_p1), 1, %s1100_s19   ;;  %p1483_p8 = scmp.ne.s32.totalorder (!%p1482_p1), %s1473_s24, 0 }
  0x85   : > { %251 = sbr.rel (%p1482_p1) target bundleno = 1010 (0x3f2), region = 40  ;;  %s1353_s2 = sshll.u32 (!%p1482_p1), %s1350_s17, 3 }
  0x86   : > { %s254_s9 = scalar_lea.sflag (!%p1482_p1), [#allocation3], %s1350_s17  ;;  %s257_s28 = scalar_lea.vmem (!%p1482_p1), [#allocation2], %s1353_s2 }
  0x8c   : > { %1075 = dma.done.wait (%p1483_p8), %s254_s9, 128  }
  0x8d   : > { %1077 = vsyncadd (%p1483_p8), %s254_s9, 4294967168  ;;  %s262_s26 = sand.u32 1, %s1171_s22   ;;  %s266_s13 = scalar_lea.vmem [#allocation5], %s1353_s2 }
  0x8e   : > { %s263_s11 = scalar_lea.sflag [#allocation6], %s262_s26 }
  0x8f   : > { %1079 = dma.done.wait (%p1483_p8), %s263_s11, 128  }
  0x90   : > { %1081 = vsyncadd (%p1483_p8), %s263_s11, 4294967168  ;;  %p1484_p11 = scmp.eq.s32.totalorder %s1171_s22, 0 }
  0x92   : > { %1083 = dma.done.wait (%p1484_p11), [#allocation6], 2048   ;;  %p1485_p0 = pmov %p1484_p11 }
  0x94   : > { %1085 = vsyncadd (%p1485_p0), [#allocation6], 4294965248  ;;  %p1486_p9 = pmov %p1485_p0 }
  0x95   : > { %p1487_p12 = pmov %p1485_p0 }
  0x96   : > { %1087 = dma.done.wait (%p1486_p9), [#allocation9], 2048  }
  0x97   : > { %1089 = vsyncadd (%p1487_p12), [#allocation9], 4294965248  ;;  %v1116_v0 = vmov 0.0|0.0   ;;  %vm1117_vm0 = vmmov 0   ;;  %v1118_v1 = vmov 0.0   ;;  %v398_v2 = vld [vmem:[%s257_s28] sm:$0xff]  ;;  %v324_v34 = vlaneseq }
  0x98   : > { %785 = vmatprep.subr.bf16.mxu0 %v1116_v0  ;;  %747 = vmatprep.mubr.msk.f32.mxu0 %vm1117_vm0, %v1118_v1  ;;  %v308_v3 = vld [vmem:[#allocation7] sm:$0xff]  ;;  %v309_v4 = vld [vmem:[#allocation7 + $0x8] sm:$0xff]  ;;  %v310_v6 = vld [vmem:[#allocation7 + $0x10] sm:$0xff]  ;;  %s678_s7 = sshll.u32 %s1171_s22, 7  ;;  %s305_s30 = scalar_lea.vmem [#allocation10], %s1353_s2 }
  0x99   : > { %809 = vmatprep.subr.bf16.mxu1 %v1116_v0  ;;  %782 = vmatprep.mubr.msk.f32.mxu1 %vm1117_vm0, %v1118_v1  ;;  %v786_v5 = vpack.c.bf16 %v309_v4, %v308_v3  ;;  %v311_v7 = vld [vmem:[#allocation7 + $0x18] sm:$0xff]  ;;  %v312_v9 = vld [vmem:[#allocation7 + $0x20] sm:$0xff]  ;;  %v313_v10 = vld [vmem:[#allocation7 + $0x28] sm:$0xff]  ;;  %v1388_v35 = vshrl.u32 %v324_v34, 7  ;;  %s550_s15 = sshll.u32 %s305_s30, 4  ;;  %s1417_s6 = scalar_lea.hbm %s1466_s5, %s678_s7  ;;  %s1419_s15 = int_to_ptr.vmem [resolvable:$true] %s550_s15 }
  0x9a   : > { %399 = vadd.xlane.f32.xlu0 %v398_v2  ;;  %v789_v8 = vpack.c.bf16 %v311_v7, %v310_v6  ;;  %v792_v11 = vpack.c.bf16 %v313_v10, %v312_v9  ;;  %v314_v12 = vld [vmem:[#allocation7 + $0x30] sm:$0xff]  ;;  %v315_v13 = vld [vmem:[#allocation7 + $0x38] sm:$0xff]  ;;  %v316_v15 = vld [vmem:[#allocation7 + $0x40] sm:$0xff]  ;;  %s537_s8 = scalar_lea.sflag [#allocation4], %s1350_s17  ;;  %s1030_s10 = scalar_lea.vmem %s1419_s15, 128 }
  0x9b   : > { %787 = vmatpush3.bf16.msra.mxu0 %v786_v5  ;;  %v795_v14 = vpack.c.bf16 %v315_v13, %v314_v12  ;;  %v317_v16 = vld [vmem:[#allocation7 + $0x48] sm:$0xff]  ;;  %v318_v18 = vld [vmem:[#allocation7 + $0x50] sm:$0xff]  ;;  %v319_v19 = vld [vmem:[#allocation7 + $0x58] sm:$0xff]  ;;  %v405_v36 = vsub.s32 5, %v1388_v35  ;;  %v326_v4 = vsub.s32 0, %v1388_v35  ;;  %v417_v5 = vsub.s32 1, %v1388_v35  ;;  %p1031_p2 = scmp.ne.s32.totalorder %s1419_s15, %s1030_s10 }
  0x9c   : > { %788 = vmatprep.subr.bf16.mxu0 %v1116_v0  ;;  %v798_v17 = vpack.c.bf16 %v317_v16, %v316_v15  ;;  %v801_v20 = vpack.c.bf16 %v319_v19, %v318_v18  ;;  %v320_v21 = vld [vmem:[#allocation7 + $0x60] sm:$0xff]  ;;  %v321_v22 = vld [vmem:[#allocation7 + $0x68] sm:$0xff]  ;;  %v428_v26 = vld [vmem:[#allocation8 + $0x10] sm:$0xff]  ;;  %v422_v6 = vsub.s32 2, %v1388_v35  ;;  %p1488_p13 = scmp.ne.s32.totalorder %s1480_s23, 0  ;;  %s1119_s22 = smov [#allocation10]  }
  0x9d   : > { %v804_v23 = vpack.c.bf16 %v321_v22, %v320_v21  ;;  %v426_v24 = vld [vmem:[#allocation8] sm:$0xff]  ;;  %v427_v25 = vld [vmem:[#allocation8 + $0x8] sm:$0xff]  ;;  %v322_v27 = vld [vmem:[#allocation7 + $0x70] sm:$0xff]  ;;  %s1034_s29 = sshll.u32 %s1119_s22, 4  ;;  %s1035_s29 = int_to_ptr.vmem [resolvable:$false] %s1034_s29 }
  0x9e   : > { %v323_v28 = vld [vmem:[#allocation7 + $0x78] sm:$0xff]  ;;  %v810_v29 = vpack.c.bf16 %v427_v25, %v426_v24  ;;  %v1394_v37 = vld [vmem:[%s1465_s4] sm:$0xff]  ;;  %v431_v45 = vld [vmem:[#allocation8 + $0x28] sm:$0xff]  ;;  %v526_v25 = vsub.s32 3, %v1388_v35  ;;  %p1032_p6 = pnand %p1031_p2, %p1488_p13  ;;  %s1036_s2 = scalar_lea.vmem %s1035_s29, 256 }
  0x9f   : > { %790 = vmatpush3.bf16.msra.mxu0 %v789_v8  ;;  %v429_v30 = vld [vmem:[#allocation8 + $0x18] sm:$0xff]  ;;  %v807_v32 = vpack.c.bf16 %v323_v28, %v322_v27  ;;  %v406_v40 = vrot.slane %v1394_v37, %v405_v36  ;;  %v430_v44 = vld [vmem:[#allocation8 + $0x20] sm:$0xff]  ;;  %v432_v47 = vld [vmem:[#allocation8 + $0x30] sm:$0xff]  ;;  %v327_v7 = vrot.slane %v1394_v37, %v326_v4  ;;  %v423_v10 = vrot.slane %v1394_v37, %v422_v6  ;;  %p1037_p4 = scmp.lt.s32.totalorder %s1419_s15, %s1035_s29  ;;  %p1038_p5 = scmp.lt.s32.totalorder %s1036_s2, %s1030_s10 }
  0xa0   : > { %791 = vmatprep.subr.bf16.mxu0 %v1116_v0  ;;  %811 = vmatpush3.bf16.msra.mxu1 %v810_v29  ;;  %v813_v31 = vpack.c.bf16 %v429_v30, %v428_v26  ;;  %v307_v33 = vld [vmem:[%s266_s13] sm:$0xff]  ;;  %v816_v46 = vpack.c.bf16 %v431_v45, %v430_v44  ;;  %v434_v50 = vld [vmem:[#allocation8 + $0x40] sm:$0xff]  ;;  %v435_v51 = vld [vmem:[#allocation8 + $0x48] sm:$0xff]  ;;  %v531_v26 = vsub.s32 4, %v1388_v35  ;;  %v527_v27 = vrot.slane %v1394_v37, %v526_v25  ;;  %p1033_p10 = pneg %p1032_p6 }
  0xa1   : > { %812 = vmatprep.subr.bf16.mxu1 %v1116_v0  ;;  %v433_v48 = vld [vmem:[#allocation8 + $0x38] sm:$0xff]  ;;  %v822_v52 = vpack.c.bf16 %v435_v51, %v434_v50  ;;  %v436_v53 = vld [vmem:[#allocation8 + $0x50] sm:$0xff]  ;;  %v438_v56 = vld [vmem:[#allocation8 + $0x60] sm:$0xff]  ;;  %p1039_p3 = por %p1038_p5, %p1037_p4 }
  0xa2   : > { %v819_v49 = vpack.c.bf16 %v433_v48, %v432_v47  ;;  %v437_v54 = vld [vmem:[#allocation8 + $0x58] sm:$0xff]  ;;  %v439_v57 = vld [vmem:[#allocation8 + $0x68] sm:$0xff]  ;;  %v440_v59 = vld [vmem:[#allocation8 + $0x70] sm:$0xff]  ;;  %v532_v30 = vrot.slane %v1394_v37, %v531_v26 }
  0xa3   : > { %793 = vmatpush3.bf16.msra.mxu0 %v792_v11  ;;  %v825_v55 = vpack.c.bf16 %v437_v54, %v436_v53  ;;  %v828_v58 = vpack.c.bf16 %v439_v57, %v438_v56  ;;  %v441_v60 = vld [vmem:[#allocation8 + $0x78] sm:$0xff]  ;;  %p1040_p7 = pnand %p1039_p3, %p1033_p10 }
  0xa4   : > { %794 = vmatprep.subr.bf16.mxu0 %v1116_v0  ;;  %814 = vmatpush3.bf16.msra.mxu1 %v813_v31  ;;  %v831_v61 = vpack.c.bf16 %v441_v60, %v440_v59 }
  0xa5   : > { %815 = vmatprep.subr.bf16.mxu1 %v1116_v0 }
  0xa7   : > { %796 = vmatpush3.bf16.msra.mxu0 %v795_v14 }
  0xa8   : > { %797 = vmatprep.subr.bf16.mxu0 %v1116_v0  ;;  %817 = vmatpush3.bf16.msra.mxu1 %v816_v46 }
  0xa9   : > { %818 = vmatprep.subr.bf16.mxu1 %v1116_v0 }
  0xab   : > { %799 = vmatpush3.bf16.msra.mxu0 %v798_v17 }
  0xac   : > { %800 = vmatprep.subr.bf16.mxu0 %v1116_v0  ;;  %820 = vmatpush3.bf16.msra.mxu1 %v819_v49 }
  0xad   : > { %821 = vmatprep.subr.bf16.mxu1 %v1116_v0 }
  0xaf   : > { %802 = vmatpush3.bf16.msra.mxu0 %v801_v20 }
  0xb0   : > { %803 = vmatprep.subr.bf16.mxu0 %v1116_v0  ;;  %823 = vmatpush3.bf16.msra.mxu1 %v822_v52 }
  0xb1   : > { %824 = vmatprep.subr.bf16.mxu1 %v1116_v0 }
  0xb3   : > { %805 = vmatpush3.bf16.msra.mxu0 %v804_v23 }
  0xb4   : > { %806 = vmatprep.subr.bf16.mxu0 %v1116_v0  ;;  %826 = vmatpush3.bf16.msra.mxu1 %v825_v55 }
  0xb5   : > { %827 = vmatprep.subr.bf16.mxu1 %v1116_v0 }
  0xb7   : > { %808 = vmatpush3.bf16.msra.mxu0 %v807_v32 }
  0xb8   : > { %829 = vmatpush3.bf16.msra.mxu1 %v828_v58 }
  0xb9   : > { %830 = vmatprep.subr.bf16.mxu1 %v1116_v0  ;;  %v418_v0 = vrot.slane %v1394_v37, %v417_v5 }
  0xba   : > { %748 = vmatmul.mubr.f32.vlgmr.msra.gmra.mrb[0].mxu0 %v307_v33 }
  0xbc   : > { %832 = vmatpush3.bf16.msra.mxu1 %v831_v61 }
 0x127   : > { %v400_v38 = vpop.xlane.xlu0 %399 }
 0x128   : > { %v401_v39 = vmul.f32 0.03125, %v400_v38 }
 0x12a   : > { %v402_v41 = vsub.f32 %v398_v2, %v401_v39 }
 0x12c   : > { %v407_v42 = vmul.f32 %v406_v40, %v402_v41 }
 0x12e   : > { %v408_v43 = vmul.f32 %v407_v42, %v407_v42 }
 0x130   : > { %409 = vadd.xlane.f32.xlu0 %v408_v43 }
 0x18d   : > { %v394_v62 = vpop.f32.mrb[0].mxu0 }
 0x18e   : > { %v749_v63 = vpop.f32.mrb[1].mxu0  ;;  %v395_v11 = vadd.f32 %v394_v62, %v327_v7 }
 0x1bd   : > { %v410_v1 = vpop.xlane.xlu0 %409 }
 0x1be   : > { %v411_v2 = vmul.f32 0.03125, %v410_v1 }
 0x1c0   : > { %v412_v3 = vadd.f32 1e-05, %v411_v2 }
 0x1c2   : > { %910 = vrsqrt.f32 %v412_v3 }
 0x1cc   : > { %v911_v8 = vpop.eup %910 }
 0x1cd   : > { %v414_v9 = vmul.f32 %v911_v8, %v402_v41 }
 0x1cf   : > { %v419_v12 = vmul.f32 %v418_v0, %v414_v9 }
 0x1d1   : > { %v424_v13 = vadd.f32 %v423_v10, %v419_v12 }
 0x1d3   : > { %v425_v14 = vmul.f32 %v424_v13, %v395_v11 }
 0x1d5   : > { %783 = vmatmul.mubr.f32.vlgmr.msra.gmra.mrb[0].mxu1 %v425_v14 }
 0x2a8   : > { %v508_v15 = vpop.f32.mrb[0].mxu1 }
 0x2a9   : > { %512 = vadd.xlane.f32.xlu1 %v508_v15  ;;  %v784_v16 = vpop.f32.mrb[1].mxu1 }
 0x336   : > { %v513_v17 = vpop.xlane.xlu1 %512 }
 0x337   : > { %v514_v18 = vmul.f32 0.03125, %v513_v17 }
 0x339   : > { %v515_v19 = vsub.f32 %v508_v15, %v514_v18 }
 0x33b   : > { %v516_v20 = vmul.f32 %v515_v19, %v406_v40 }
 0x33d   : > { %v517_v21 = vmul.f32 %v516_v20, %v516_v20 }
 0x33f   : > { %518 = vadd.xlane.f32.xlu1 %v517_v21 }
 0x3cc   : > { %v519_v22 = vpop.xlane.xlu1 %518 }
 0x3cd   : > { %v520_v23 = vmul.f32 0.03125, %v519_v22 }
 0x3cf   : > { %v521_v24 = vadd.f32 1e-05, %v520_v23 }
 0x3d1   : > { %912 = vrsqrt.f32 %v521_v24 }
 0x3db   : > { %v913_v28 = vpop.eup %912 }
 0x3dc   : > { %v523_v29 = vmul.f32 %v913_v28, %v515_v19 }
 0x3de   : > { %v528_v31 = vmul.f32 %v527_v27, %v523_v29 }
 0x3e0   : > { %v533_v32 = vadd.f32 %v532_v30, %v528_v31 }
 0x3e2   : > { %v534_v33 = vmax.f32 %v533_v32, 0.0 }
 0x3e4   : > { %535 = vst [vmem:[%s305_s30] sm:$0xff] %v534_v33 }
 0x3e5   : > { %1043 = shalt.err (!%p1040_p7)
}
 0x3e6   : > { %s1044_s17 = scalar_lea.hbm %s1417_s6, 128  ;;  %s1048_s26 = scalar_lea.hbm %s1466_s5, 256 }
 0x3e7   : > { %p1045_p1 = scmp.ne.s32.totalorder %s1417_s6, %s1044_s17  ;;  %p1049_p0 = scmp.lt.u32.totalorder %s1417_s6, %s1466_s5 }
 0x3e8   : > { %p1050_p9 = scmp.lt.u32.totalorder %s1048_s26, %s1044_s17  ;;  %p1052_p2 = scmp.lt.u32.totalorder %s1044_s17, %s1417_s6 }
 0x3e9   : > { %p1046_p8 = pnand %p1045_p1, %p1488_p13 }
 0x3ea   : > { %p1051_p12 = por %p1050_p9, %p1049_p0 }
 0x3eb   : > { %p1047_p11 = pneg %p1046_p8 }
 0x3ec   : > { %p1053_p6 = por %p1052_p2, %p1051_p12 }
 0x3ee   : > { %p1054_p10 = pnand %p1053_p6, %p1047_p11 }
 0x3f0   : > { %1057 = shalt.err (!%p1054_p10)
}
 0x3f1   : > { %845 = dma.vmem_to_hbm [thread:$0]  (%p1488_p13), %s1419_s15, 128, %s1417_s6, %s537_s8  }
 0x3f2 PF: > { %s562_s24 = sand.u32 1, %s1096_s18   ;;  %p1489_p4 = scmp.ne.s32.totalorder %s1474_s25, 0 }
 0x3f3   : > { %p1490_p5 = scmp.ge.s32.totalorder %s1108_s21, 2  ;;  %s563_s16 = scalar_lea.sflag [#allocation4], %s562_s24 }
 0x3f5   : > { %p862_p3 = pnand %p1490_p5, %p1489_p4 }
 0x3f7   : > { %1091 = dma.done.wait (!%p862_p3), %s563_s16, 128  }
 0x3f8   : > { %1093 = vsyncadd (!%p862_p3), %s563_s16, 4294967168  ;;  %p22_p7 = scmp.ge.s32.totalorder %s1260_s14, 4   ;;  %s1491_s18 = smov %s1100_s19 }
 0x3f9   : > { %s1492_s19 = smov %s1104_s20  ;;  %s1493_s20 = smov %s1276_s27 }
 0x3fa   : > { %s1494_s21 = smov %s1260_s14  ;;  %24 = sbr.rel (!%p22_p7) target bundleno = 11 (0xb), region = 106 }
 0x401   :  { %568 = vsyncpa [#allocation3], 1 }
 0x402   :  { %570 = vsyncpa [#allocation3 + $0x1], 1 }
 0x403   :  { %571 = vsyncpa [#allocation6], 1 }
 0x404   :  { %573 = vsyncpa [#allocation6 + $0x1], 1 }
 0x405   :  { %574 = vsyncpa [#allocation9], 1 }
 0x406   :  { %575 = vsyncpa [#allocation4], 1 }
 0x407   :  { %577 = vsyncpa [#allocation4 + $0x1], 1 }

</bundles_post_ra>
